<compile_context>
chip_gen: v6e
topology: v6e:2x2x1
jax: 0.10.0
libtpu: 0.0.40
codegen_flags: <defaults>
</compile_context>

<pallas_src>
import functools

import jax
import jax.numpy as jnp
from jax.experimental import pallas as pl
from jax.experimental.pallas import tpu as pltpu


# ---------------------------------------------------------------------------
# Single fused kernel: whole Head forward for `seqs_per_block` sequences.
# ---------------------------------------------------------------------------
def _head_kernel(x_ref, lab_ref, wfeat_ref, bfeat_ref, wfuse_ref, bfuse_ref,
                 wout_ref, bout_ref, o_ref, *,
                 n_train_rows, rows_per_seq, seqs_per_block):
    f32 = jnp.float32
    cdt = wfeat_ref.dtype  # bf16 compute dtype for MXU operands

    # feature_extractor for BOTH modalities in one matmul: x = [xv | xt] lanes,
    # wfeat = blockdiag(w_feat, w_feat)  ->  h = [hv | ht]   (Bblk*R, 2C) f32
    h = jnp.dot(x_ref[...], wfeat_ref[...], preferred_element_type=f32)
    h = jnp.maximum(h + bfeat_ref[...], 0.0)

    # modals_fusion: relu([hv | ht] @ w_fuse + b_fuse)        (Bblk*R, C) f32
    fused = jnp.dot(h.astype(cdt), wfuse_ref[...], preferred_element_type=f32)
    fused = jnp.maximum(fused + bfuse_ref[...], 0.0)

    C = fused.shape[-1]
    n_test_rows = rows_per_seq - n_train_rows
    fused3 = fused.reshape(seqs_per_block, rows_per_seq, C)
    train = fused3[:, :n_train_rows, :].reshape(seqs_per_block * n_train_rows, C)
    test = fused3[:, n_train_rows:, :]                     # (Bblk, T, C) f32

    # filter_predictor: label-weighted pooling as ONE M=Bblk matmul against a
    # block-diagonal, pre-normalized train label.
    filt = jnp.dot(lab_ref[...], train.astype(cdt),
                   preferred_element_type=f32)             # (Bblk, C) f32

    # classifier + bb_regressor share the filter-modulated features
    # (separate_filters_for_cls_and_bbreg=False).  One fused matmul against
    # w_out = [ones | w_bb | 0-pad] emits [score | bbox(4) | pad(3)].
    mod = (test * filt[:, None, :]).reshape(seqs_per_block * n_test_rows, C)
    out = jnp.dot(mod.astype(cdt), wout_ref[...],
                  preferred_element_type=f32) + bout_ref[...]   # (Bblk*T, 8) f32

    # lane-dense single store: (8, Bblk*T)
    o_ref[...] = jnp.transpose(out)


# ---------------------------------------------------------------------------
# Parameters (deterministic synthetic init) and Head forward (thin JAX glue).
# ---------------------------------------------------------------------------
def init_params(key, c_in, c_head):
    k = jax.random.split(key, 3)
    s = 0.1
    return {
        "w_feat": s * jax.random.normal(k[0], (c_in, c_head), jnp.float32),
        "b_feat": jnp.zeros((c_head,), jnp.float32),
        "w_fuse": s * jax.random.normal(k[1], (2 * c_head, c_head), jnp.float32),
        "b_fuse": jnp.zeros((c_head,), jnp.float32),
        "w_bb": s * jax.random.normal(k[2], (c_head, 4), jnp.float32),
        "b_bb": jnp.zeros((4,), jnp.float32),
    }


def head_forward(params, train_feat_v, train_feat_t, test_feat_v, test_feat_t,
                 train_bb, train_label, *, compute_dtype=jnp.bfloat16,
                 seq_block=None):
    assert train_bb.ndim == 3
    num_sequences = train_bb.shape[1]

    Ftr, B, Cin, H, W = train_feat_v.shape
    Fte = test_feat_v.shape[0]
    assert B == num_sequences
    C = params["w_feat"].shape[1]
    HW = H * W
    Ntr = Ftr * HW                   # train rows per sequence
    T = Fte * HW                     # test rows per sequence
    R = Ntr + T                      # all rows per sequence
    # aligned static train/test split inside the kernel (no relayout copy)
    assert Ntr % 8 == 0 and T % 8 == 0, "pad frames/spatial to a sublane multiple"

    # -- sequences per grid step: fatten MXU M, keep >=4 steps (2 TCs on v7x) --
    if seq_block is None:
        seq_block = max(1, B // 4) if B >= 4 else B
    seq_block = min(seq_block, B, 32)
    n_blocks = -(-B // seq_block)
    B_pad = n_blocks * seq_block

    # Channels-last rows, visible|thermal lane-concat, one flat row slab.
    def to_rows(feat):
        f = feat.shape[0]
        return jnp.transpose(feat, (1, 0, 3, 4, 2)).reshape(B, f * HW, Cin)

    xv = jnp.concatenate([to_rows(train_feat_v), to_rows(test_feat_v)], axis=1)
    xt = jnp.concatenate([to_rows(train_feat_t), to_rows(test_feat_t)], axis=1)
    x = jnp.concatenate([xv, xt], axis=-1).astype(compute_dtype)   # (B, R, 2Cin)
    if B_pad != B:
        x = jnp.pad(x, ((0, B_pad - B), (0, 0), (0, 0)))
    x = x.reshape(B_pad * R, 2 * Cin)

    # Pre-normalized train label, block-diagonal per grid step so the filter
    # pooling is one (Bblk, Bblk*Ntr) @ (Bblk*Ntr, C) matmul.
    lab = jnp.transpose(train_label, (1, 0, 2, 3)).reshape(B, Ntr)
    lab = lab / (jnp.sum(lab, axis=1, keepdims=True) + 1e-6)
    if B_pad != B:
        lab = jnp.pad(lab, ((0, B_pad - B), (0, 0)))
    lab_blocks = lab.reshape(n_blocks, seq_block, Ntr)
    eye = jnp.eye(seq_block, dtype=lab.dtype)
    lab_bd = (lab_blocks[:, :, None, :] * eye[None, :, :, None]).reshape(
        n_blocks, seq_block, seq_block * Ntr).astype(compute_dtype)

    # Block-diagonal feature weight: both modalities in one matmul.
    wf = params["w_feat"]
    z = jnp.zeros_like(wf)
    w_feat_blk = jnp.concatenate(
        [jnp.concatenate([wf, z], axis=1), jnp.concatenate([z, wf], axis=1)],
        axis=0).astype(compute_dtype)                               # (2Cin, 2C)
    b_feat_cat = jnp.concatenate([params["b_feat"], params["b_feat"]]
                                 ).reshape(1, 2 * C).astype(jnp.float32)
    w_fuse = params["w_fuse"].astype(compute_dtype)                 # (2C, C)
    b_fuse = params["b_fuse"].reshape(1, C).astype(jnp.float32)

    # Fused classifier+bbox output weight: [ ones | w_bb | 0-pad ] -> 8 lanes.
    w_out = jnp.concatenate(
        [jnp.ones((C, 1), jnp.float32), params["w_bb"],
         jnp.zeros((C, 3), jnp.float32)], axis=1).astype(compute_dtype)  # (C, 8)
    b_out = jnp.concatenate(
        [jnp.zeros((1,), jnp.float32), params["b_bb"],
         jnp.zeros((3,), jnp.float32)]).reshape(1, 8).astype(jnp.float32)

    kernel = functools.partial(_head_kernel, n_train_rows=Ntr,
                               rows_per_seq=R, seqs_per_block=seq_block)
    out = pl.pallas_call(
        kernel,
        out_shape=jax.ShapeDtypeStruct((n_blocks, 8, seq_block * T), jnp.float32),
        grid=(n_blocks,),
        in_specs=[
            pl.BlockSpec((seq_block * R, 2 * Cin), lambda i: (i, 0)),          # rows
            pl.BlockSpec((None, seq_block, seq_block * Ntr), lambda i: (i, 0, 0)),  # label
            pl.BlockSpec((2 * Cin, 2 * C), lambda i: (0, 0)),                  # w_feat blockdiag
            pl.BlockSpec((1, 2 * C), lambda i: (0, 0)),                        # b_feat (x2)
            pl.BlockSpec((2 * C, C), lambda i: (0, 0)),                        # w_fuse
            pl.BlockSpec((1, C), lambda i: (0, 0)),                            # b_fuse
            pl.BlockSpec((C, 8), lambda i: (0, 0)),                            # w_out
            pl.BlockSpec((1, 8), lambda i: (0, 0)),                            # b_out
        ],
        out_specs=pl.BlockSpec((None, 8, seq_block * T), lambda i: (i, 0, 0)),
        compiler_params=pltpu.CompilerParams(
            dimension_semantics=("parallel",)),   # grid steps shard across TCs (v7x)
    )(x, lab_bd, w_feat_blk, b_feat_cat, w_fuse, b_fuse, w_out, b_out)

    # Epilogue reshapes on the (n_blocks, 8, Bblk*T) lane-dense slab.
    out = out.reshape(n_blocks, 8, seq_block, Fte, H, W)
    out = jnp.transpose(out, (3, 0, 2, 1, 4, 5)).reshape(Fte, B_pad, 8, H, W)
    out = out[:, :B]
    target_scores = out[:, :, 0]          # (Fte, B, H, W)
    bbox_preds = out[:, :, 1:5]           # (Fte, B, 4, H, W)
    return target_scores, bbox_preds


if __name__ == "__main__":
    key = jax.random.PRNGKey(0)
    keys = jax.random.split(key, 6)

    Ftr, Fte, B = 2, 1, 8          # Head.forward hard-codes train_feat[0], [1] -> Ftr=2
    Cin, C = 8, 16
    H = W = 8

    train_feat_v = jax.random.normal(keys[0], (Ftr, B, Cin, H, W), jnp.float32)
    train_feat_t = jax.random.normal(keys[1], (Ftr, B, Cin, H, W), jnp.float32)
    test_feat_v = jax.random.normal(keys[2], (Fte, B, Cin, H, W), jnp.float32)
    test_feat_t = jax.random.normal(keys[3], (Fte, B, Cin, H, W), jnp.float32)
    train_bb = jax.random.uniform(keys[4], (Ftr, B, 4), jnp.float32)

    # Gaussian train label (the *args payload consumed by filter_predictor)
    yy, xx = jnp.meshgrid(jnp.arange(H), jnp.arange(W), indexing="ij")
    g = jnp.exp(-((yy - H / 2.0) ** 2 + (xx - W / 2.0) ** 2) / (2.0 * 2.0 ** 2))
    train_label = jnp.broadcast_to(g.astype(jnp.float32), (Ftr, B, H, W))

    params = init_params(keys[5], Cin, C)

    head = jax.jit(head_forward)
    target_scores, bbox_preds = head(
        params, train_feat_v, train_feat_t, test_feat_v, test_feat_t,
        train_bb, train_label)
    jax.block_until_ready((target_scores, bbox_preds))

    assert target_scores.shape == (Fte, B, H, W)
    assert bbox_preds.shape == (Fte, B, 4, H, W)
    print("KERNEL_OK")
</pallas_src>

<mosaic_0001>
module attributes {stable_mosaic.version = 11 : i64} {
  func.func @_head_kernel(%arg0: i32, %arg1: memref<384x16xbf16, #tpu.memory_space<vmem>>, %arg2: memref<1x2x256xbf16, #tpu.memory_space<vmem>>, %arg3: memref<16x32xbf16, #tpu.memory_space<vmem>>, %arg4: memref<1x32xf32, #tpu.memory_space<vmem>>, %arg5: memref<32x16xbf16, #tpu.memory_space<vmem>>, %arg6: memref<1x16xf32, #tpu.memory_space<vmem>>, %arg7: memref<16x8xbf16, #tpu.memory_space<vmem>>, %arg8: memref<1x8xf32, #tpu.memory_space<vmem>>, %arg9: memref<1x8x128xf32, #tpu.memory_space<vmem>>) attributes {dimension_semantics = [#tpu.dimension_semantics<parallel>], iteration_bounds = array<i64: 4>, scalar_prefetch = 0 : i64, scratch_operands = 0 : i64, tpu.core_type = #tpu.core_type<tc>, window_params = [{transform_indices = @transform_0, window_bounds = array<i64: 384, 16>}, {transform_indices = @transform_1, window_bounds = array<i64: 1, 2, 256>}, {pipeline_mode = #tpu.pipeline_mode<synchronous>, transform_indices = @transform_2, window_bounds = array<i64: 16, 32>}, {pipeline_mode = #tpu.pipeline_mode<synchronous>, transform_indices = @transform_3, window_bounds = array<i64: 1, 32>}, {pipeline_mode = #tpu.pipeline_mode<synchronous>, transform_indices = @transform_4, window_bounds = array<i64: 32, 16>}, {pipeline_mode = #tpu.pipeline_mode<synchronous>, transform_indices = @transform_5, window_bounds = array<i64: 1, 16>}, {pipeline_mode = #tpu.pipeline_mode<synchronous>, transform_indices = @transform_6, window_bounds = array<i64: 16, 8>}, {pipeline_mode = #tpu.pipeline_mode<synchronous>, transform_indices = @transform_7, window_bounds = array<i64: 1, 8>}, {transform_indices = @transform_8, window_bounds = array<i64: 1, 8, 128>}]} {
    %c0 = arith.constant 0 : index
    %c0_0 = arith.constant 0 : index
    %0 = vector.load %arg1[%c0, %c0_0] : memref<384x16xbf16, #tpu.memory_space<vmem>>, vector<384x16xbf16>
    %c0_1 = arith.constant 0 : index
    %c0_2 = arith.constant 0 : index
    %1 = vector.load %arg3[%c0_1, %c0_2] : memref<16x32xbf16, #tpu.memory_space<vmem>>, vector<16x32xbf16>
    %cst = arith.constant dense<0.000000e+00> : vector<384x32xf32>
    %2 = tpu.matmul %0, %1, %cst {dimension_numbers = #tpu.dot_dimension_numbers<[1], [0], [0], [1], [0, 0, 1, 1], [], []>} : vector<384x16xbf16>, vector<16x32xbf16>, vector<384x32xf32> -> vector<384x32xf32>
    %c0_3 = arith.constant 0 : index
    %c0_4 = arith.constant 0 : index
    %3 = vector.load %arg4[%c0_3, %c0_4] : memref<1x32xf32, #tpu.memory_space<vmem>>, vector<1x32xf32>
    %4 = vector.broadcast %3 : vector<1x32xf32> to vector<384x32xf32>
    %5 = arith.addf %2, %4 : vector<384x32xf32>
    %cst_5 = arith.constant 0.000000e+00 : f32
    %6 = vector.broadcast %cst_5 : f32 to vector<384x32xf32>
    %7 = arith.maximumf %5, %6 : vector<384x32xf32>
    %8 = arith.truncf %7 : vector<384x32xf32> to vector<384x32xbf16>
    %c0_6 = arith.constant 0 : index
    %c0_7 = arith.constant 0 : index
    %9 = vector.load %arg5[%c0_6, %c0_7] : memref<32x16xbf16, #tpu.memory_space<vmem>>, vector<32x16xbf16>
    %cst_8 = arith.constant dense<0.000000e+00> : vector<384x16xf32>
    %10 = tpu.matmul %8, %9, %cst_8 {dimension_numbers = #tpu.dot_dimension_numbers<[1], [0], [0], [1], [0, 0, 1, 1], [], []>} : vector<384x32xbf16>, vector<32x16xbf16>, vector<384x16xf32> -> vector<384x16xf32>
    %c0_9 = arith.constant 0 : index
    %c0_10 = arith.constant 0 : index
    %11 = vector.load %arg6[%c0_9, %c0_10] : memref<1x16xf32, #tpu.memory_space<vmem>>, vector<1x16xf32>
    %12 = vector.broadcast %11 : vector<1x16xf32> to vector<384x16xf32>
    %13 = arith.addf %10, %12 : vector<384x16xf32>
    %cst_11 = arith.constant 0.000000e+00 : f32
    %14 = vector.broadcast %cst_11 : f32 to vector<384x16xf32>
    %15 = arith.maximumf %13, %14 : vector<384x16xf32>
    %16 = vector.shape_cast %15 : vector<384x16xf32> to vector<2x192x16xf32>
    %17 = vector.extract_strided_slice %16 {offsets = [0, 0, 0], sizes = [2, 128, 16], strides = [1, 1, 1]} : vector<2x192x16xf32> to vector<2x128x16xf32>
    %18 = vector.shape_cast %17 : vector<2x128x16xf32> to vector<256x16xf32>
    %19 = vector.extract_strided_slice %16 {offsets = [0, 128, 0], sizes = [2, 64, 16], strides = [1, 1, 1]} : vector<2x192x16xf32> to vector<2x64x16xf32>
    %c0_12 = arith.constant 0 : index
    %c0_13 = arith.constant 0 : index
    %c0_14 = arith.constant 0 : index
    %20 = vector.load %arg2[%c0_12, %c0_13, %c0_14] : memref<1x2x256xbf16, #tpu.memory_space<vmem>>, vector<1x2x256xbf16>
    %21 = vector.shape_cast %20 : vector<1x2x256xbf16> to vector<2x256xbf16>
    %22 = arith.truncf %18 : vector<256x16xf32> to vector<256x16xbf16>
    %cst_15 = arith.constant dense<0.000000e+00> : vector<2x16xf32>
    %23 = tpu.matmul %21, %22, %cst_15 {dimension_numbers = #tpu.dot_dimension_numbers<[1], [0], [0], [1], [0, 0, 1, 1], [], []>} : vector<2x256xbf16>, vector<256x16xbf16>, vector<2x16xf32> -> vector<2x16xf32>
    %24 = vector.shape_cast %23 : vector<2x16xf32> to vector<2x1x16xf32>
    %25 = vector.broadcast %24 : vector<2x1x16xf32> to vector<2x64x16xf32>
    %26 = arith.mulf %19, %25 : vector<2x64x16xf32>
    %27 = vector.shape_cast %26 : vector<2x64x16xf32> to vector<128x16xf32>
    %28 = arith.truncf %27 : vector<128x16xf32> to vector<128x16xbf16>
    %c0_16 = arith.constant 0 : index
    %c0_17 = arith.constant 0 : index
    %29 = vector.load %arg7[%c0_16, %c0_17] : memref<16x8xbf16, #tpu.memory_space<vmem>>, vector<16x8xbf16>
    %cst_18 = arith.constant dense<0.000000e+00> : vector<128x8xf32>
    %30 = tpu.matmul %28, %29, %cst_18 {dimension_numbers = #tpu.dot_dimension_numbers<[1], [0], [0], [1], [0, 0, 1, 1], [], []>} : vector<128x16xbf16>, vector<16x8xbf16>, vector<128x8xf32> -> vector<128x8xf32>
    %c0_19 = arith.constant 0 : index
    %c0_20 = arith.constant 0 : index
    %31 = vector.load %arg8[%c0_19, %c0_20] : memref<1x8xf32, #tpu.memory_space<vmem>>, vector<1x8xf32>
    %32 = vector.broadcast %31 : vector<1x8xf32> to vector<128x8xf32>
    %33 = arith.addf %30, %32 : vector<128x8xf32>
    %34 = tpu.transpose %33, [1, 0] : vector<128x8xf32> -> vector<8x128xf32>
    %c0_21 = arith.constant 0 : index
    %c0_22 = arith.constant 0 : index
    %c0_23 = arith.constant 0 : index
    %35 = vector.load %arg9[%c0_21, %c0_22, %c0_23] : memref<1x8x128xf32, #tpu.memory_space<vmem>>, vector<1x8x128xf32>
    %36 = vector.shape_cast %35 : vector<1x8x128xf32> to vector<8x128xf32>
    %37 = vector.shape_cast %34 : vector<8x128xf32> to vector<1x8x128xf32>
    tpu.vector_store %arg9[%c0_21, %c0_22, %c0_23], %37 {strides = array<i32>} : memref<1x8x128xf32, #tpu.memory_space<vmem>>, vector<1x8x128xf32>,
    return
  }
  func.func @transform_0(%arg0: i32) -> (i32, i32) {
    %c0_i32 = arith.constant 0 : i32
    %c0_i32_0 = arith.constant 0 : i32
    return %arg0, %c0_i32 : i32, i32
  }
  func.func @transform_1(%arg0: i32) -> (i32, i32, i32) {
    %c0_i32 = arith.constant 0 : i32
    %c0_i32_0 = arith.constant 0 : i32
    %c0_i32_1 = arith.constant 0 : i32
    return %arg0, %c0_i32, %c0_i32_0 : i32, i32, i32
  }
  func.func @transform_2(%arg0: i32) -> (i32, i32) {
    %c0_i32 = arith.constant 0 : i32
    %c0_i32_0 = arith.constant 0 : i32
    %c0_i32_1 = arith.constant 0 : i32
    return %c0_i32, %c0_i32_0 : i32, i32
  }
  func.func @transform_3(%arg0: i32) -> (i32, i32) {
    %c0_i32 = arith.constant 0 : i32
    %c0_i32_0 = arith.constant 0 : i32
    %c0_i32_1 = arith.constant 0 : i32
    return %c0_i32, %c0_i32_0 : i32, i32
  }
  func.func @transform_4(%arg0: i32) -> (i32, i32) {
    %c0_i32 = arith.constant 0 : i32
    %c0_i32_0 = arith.constant 0 : i32
    %c0_i32_1 = arith.constant 0 : i32
    return %c0_i32, %c0_i32_0 : i32, i32
  }
  func.func @transform_5(%arg0: i32) -> (i32, i32) {
    %c0_i32 = arith.constant 0 : i32
    %c0_i32_0 = arith.constant 0 : i32
    %c0_i32_1 = arith.constant 0 : i32
    return %c0_i32, %c0_i32_0 : i32, i32
  }
  func.func @transform_6(%arg0: i32) -> (i32, i32) {
    %c0_i32 = arith.constant 0 : i32
    %c0_i32_0 = arith.constant 0 : i32
    %c0_i32_1 = arith.constant 0 : i32
    return %c0_i32, %c0_i32_0 : i32, i32
  }
  func.func @transform_7(%arg0: i32) -> (i32, i32) {
    %c0_i32 = arith.constant 0 : i32
    %c0_i32_0 = arith.constant 0 : i32
    %c0_i32_1 = arith.constant 0 : i32
    return %c0_i32, %c0_i32_0 : i32, i32
  }
  func.func @transform_8(%arg0: i32) -> (i32, i32, i32) {
    %c0_i32 = arith.constant 0 : i32
    %c0_i32_0 = arith.constant 0 : i32
    %c0_i32_1 = arith.constant 0 : i32
    return %arg0, %c0_i32, %c0_i32_0 : i32, i32, i32
  }
}

</mosaic_0001>

<bundles_post_ra>
// kernel: head_forward.1
= control target key start
LH: loop header
LB: loop body
LE: loop exit
PB: predicated region body
PF: predicated region fallthrough
CT: control target
= control target key end

     0   :  { %s2012_s27 = smov 0   ;;  %s2314_s0 = inlined_call_operand.vmem [shape: bf16[1536,16], index: 0, kind: input, shape index: {}]   ;;  %s2315_s1 = inlined_call_operand.vmem [shape: bf16[4,2,256], index: 1, kind: input, shape index: {}]   ;;  %s2316_s2 = inlined_call_operand.vmem [shape: bf16[16,32], index: 2, kind: input, shape index: {}]   ;;  %s2317_s3 = inlined_call_operand.vmem [shape: f32[1,32], index: 3, kind: input, shape index: {}]   ;;  %s2318_s4 = inlined_call_operand.vmem [shape: bf16[32,16], index: 4, kind: input, shape index: {}]   ;;  %s2319_s5 = inlined_call_operand.vmem [shape: f32[1,16], index: 5, kind: input, shape index: {}]   ;;  %s2320_s6 = inlined_call_operand.vmem [shape: bf16[16,8], index: 6, kind: input, shape index: {}]   ;;  %s2321_s7 = inlined_call_operand.vmem [shape: f32[1,8], index: 7, kind: input, shape index: {}]   ;;  %s2322_s8 = inlined_call_operand.vmem [shape: f32[4,8,128], index: 8, kind: output, shape index: {}]  }
   0x1 LB: > { %s2018_s28 = sadd.s32 4294967295, %s1964_s27   ;;  %p1623_p0 = scmp.ge.s32.totalorder %s1964_s27, 1  ;;  %s1964_s27 = sphi %s2012_s27, %s18_s27  }
   0x2   : > { %p272_p1 = scmp.lt.s32.totalorder %s1964_s27, 5 }
   0x4   : > { %p273_p2 = pnand %p1623_p0, %p272_p1 }
   0x5   : > { %s309_s9 = smul.u32 (!%p273_p2), 48, %s2018_s28  ;;  %p315_p4 = scmp.lt.s32.totalorder (!%p273_p2), %s2018_s28, 3 }
   0x6   : > { %276 = sbr.rel (%p273_p2) target bundleno = 1060 (0x424), region = 52 }
   0x7   : > { %p310_p3 = scmp.lt.s32.totalorder (!%p273_p2), %s309_s9, 191 }
   0xb   : > { %v1930_v0 = vld [vmem:[%s2316_s2] sm:$0xff]   ;;  %s2324_s9 = smov (!%p310_p3, %s309_s9), 191  ;;  %vm507_vm0 = vcmask 130048   ;;  %v1951_v21 = vld [vmem:[%s2318_s4 + $0x8] sm:$0xff]   ;;  %vm900_vm1 = vcmask 261120   ;;  %s2326_s28 = smov (!%p315_p4, %s2018_s28), 3 }
   0xc   : > { %1799 = vmatprep.subr.bf16.mxu0 %v1930_v0  ;;  %s1624_s10 = sshll.u32 %s2324_s9, 2  ;;  %1849 = vmatprep.subr.bf16.mxu1 %v1951_v21  ;;  %v1952_v22 = vld [vmem:[%s2318_s4] sm:$0xff]   ;;  %s1625_s20 = sshll.u32 %s2326_s28, 1 }
   0xd   : > { %1800 = vmatpush3.bf16.msra.mxu0 %v1930_v0  ;;  %s2029_s13 = scalar_lea.vmem %s2314_s0, %s1624_s10  ;;  %1850 = vmatpush3.bf16.msra.mxu1 %v1951_v21  ;;  %v2088_v29 = vld [vmem:[%s2317_s3] ss:$0 sm:$0xff]  ;;  %s318_s23 = scalar_lea.vmem %s2315_s1, %s1625_s20 }
   0xe   : > { %v1931_v1 = vld [vmem:[%s2029_s13] sm:$0xff]   ;;  %v1932_v2 = vld [vmem:[%s2029_s13 + $0x8] sm:$0xff]   ;;  %v1933_v3 = vld [vmem:[%s2029_s13 + $0x10] sm:$0xff]   ;;  %1851 = vmatprep.subr.bf16.mxu1 %v1952_v22  ;;  %s1626_s10 = sshll.u32 %s2326_s28, 3 }
   0xf   : > { %1801 = vmatprep.mubr.msk.bf16.mxu0 %vm507_vm0, %v1931_v1  ;;  %v1934_v4 = vld [vmem:[%s2029_s13 + $0x18] sm:$0xff]   ;;  %v1935_v5 = vld [vmem:[%s2029_s13 + $0x20] sm:$0xff]   ;;  %v1936_v6 = vld [vmem:[%s2029_s13 + $0x28] sm:$0xff]  }
  0x10   : > { %1802 = vmatmul.mubr.msk.bf16.vlgmr.msra.gmra.mxu0 %vm507_vm0, %v1932_v2  ;;  %v1937_v7 = vld [vmem:[%s2029_s13 + $0x30] sm:$0xff]   ;;  %v1938_v8 = vld [vmem:[%s2029_s13 + $0x38] sm:$0xff]   ;;  %v1939_v9 = vld [vmem:[%s2029_s13 + $0x40] sm:$0xff]  }
  0x11   : > { %1805 = vmatprep.mubr.msk.bf16.mxu0 %vm507_vm0, %v1933_v3  ;;  %v1940_v10 = vld [vmem:[%s2029_s13 + $0x48] sm:$0xff]   ;;  %v1941_v11 = vld [vmem:[%s2029_s13 + $0x50] sm:$0xff]   ;;  %v1942_v12 = vld [vmem:[%s2029_s13 + $0x58] sm:$0xff]   ;;  %1852 = vmatpush3.bf16.msra.mxu1 %v1952_v22 }
  0x12   : > { %v1943_v13 = vld [vmem:[%s2029_s13 + $0x60] sm:$0xff]   ;;  %v1944_v14 = vld [vmem:[%s2029_s13 + $0x68] sm:$0xff]   ;;  %v1945_v15 = vld [vmem:[%s2029_s13 + $0x70] sm:$0xff]  }
  0x13   : > { %v1946_v16 = vld [vmem:[%s2029_s13 + $0x78] sm:$0xff]   ;;  %v1947_v17 = vld [vmem:[%s2029_s13 + $0x80] sm:$0xff]   ;;  %v1948_v18 = vld [vmem:[%s2029_s13 + $0x88] sm:$0xff]  }
  0x14   : > { %v1949_v19 = vld [vmem:[%s2029_s13 + $0x90] sm:$0xff]   ;;  %v1950_v20 = vld [vmem:[%s2029_s13 + $0x98] sm:$0xff]   ;;  %v1953_v23 = vld [vmem:[%s2029_s13 + $0xa0] sm:$0xff]  }
  0x15   : > { %v1954_v24 = vld [vmem:[%s2029_s13 + $0xa8] sm:$0xff]   ;;  %v1955_v25 = vld [vmem:[%s2029_s13 + $0xb0] sm:$0xff]   ;;  %v1956_v26 = vld [vmem:[%s2029_s13 + $0xb8] sm:$0xff]   ;;  %s322_s13 = scalar_lea.vmem %s2322_s8, %s1626_s10 }
  0x18   : > { %1806 = vmatmul.mubr.msk.bf16.gmra.mxu0 %vm507_vm0, %v1934_v4 }
  0x19   : > { %1809 = vmatprep.mubr.msk.bf16.mxu0 %vm507_vm0, %v1935_v5 }
  0x20   : > { %1810 = vmatmul.mubr.msk.bf16.gmra.mxu0 %vm507_vm0, %v1936_v6 }
  0x21   : > { %1813 = vmatprep.mubr.msk.bf16.mxu0 %vm507_vm0, %v1937_v7 }
  0x28   : > { %1814 = vmatmul.mubr.msk.bf16.gmra.mxu0 %vm507_vm0, %v1938_v8 }
  0x29   : > { %1817 = vmatprep.mubr.msk.bf16.mxu0 %vm507_vm0, %v1939_v9 }
  0x30   : > { %1818 = vmatmul.mubr.msk.bf16.gmra.mxu0 %vm507_vm0, %v1940_v10 }
  0x31   : > { %1821 = vmatprep.mubr.msk.bf16.mxu0 %vm507_vm0, %v1941_v11 }
  0x38   : > { %1822 = vmatmul.mubr.msk.bf16.gmra.mxu0 %vm507_vm0, %v1942_v12 }
  0x39   : > { %1825 = vmatprep.mubr.msk.bf16.mxu0 %vm507_vm0, %v1943_v13 }
  0x40   : > { %1826 = vmatmul.mubr.msk.bf16.gmra.mxu0 %vm507_vm0, %v1944_v14 }
  0x41   : > { %1829 = vmatprep.mubr.msk.bf16.mxu0 %vm507_vm0, %v1945_v15 }
  0x48   : > { %1830 = vmatmul.mubr.msk.bf16.gmra.mxu0 %vm507_vm0, %v1946_v16 }
  0x49   : > { %1833 = vmatprep.mubr.msk.bf16.mxu0 %vm507_vm0, %v1947_v17 }
  0x50   : > { %1834 = vmatmul.mubr.msk.bf16.gmra.mxu0 %vm507_vm0, %v1948_v18 }
  0x51   : > { %1837 = vmatprep.mubr.msk.bf16.mxu0 %vm507_vm0, %v1949_v19 }
  0x58   : > { %1838 = vmatmul.mubr.msk.bf16.gmra.mxu0 %vm507_vm0, %v1950_v20 }
  0x59   : > { %1841 = vmatprep.mubr.msk.bf16.mxu0 %vm507_vm0, %v1953_v23 }
  0x60   : > { %1842 = vmatmul.mubr.msk.bf16.gmra.mxu0 %vm507_vm0, %v1954_v24 }
  0x61   : > { %1845 = vmatprep.mubr.msk.bf16.mxu0 %vm507_vm0, %v1955_v25 }
  0x68   : > { %1846 = vmatmul.mubr.msk.bf16.gmra.mxu0 %vm507_vm0, %v1956_v26 }
  0xd0   : > { %v1803_v27 = vpop.f32.mrf.mxu0 }
  0xd1   : > { %v623_v33 = vadd.f32 %v1803_v27, %v2088_v29 }
  0xd2   : > { %v614_v28 = vpop.f32.mrf.mxu0 }
  0xd3   : > { %v615_v31 = vadd.f32 %v2088_v29, %v614_v28  ;;  %v807_v40 = vmax.f32 %v623_v33, 0.0 }
  0xd4   : > { %v1804_v30 = vpop.f32.mrf.mxu0 }
  0xd5   : > { %v626_v32 = vadd.f32 %v1804_v30, %v2088_v29  ;;  %v805_v38 = vmax.f32 %v615_v31, 0.0 }
  0xd6   : > { %v617_v34 = vpop.f32.mrf.mxu0 }
  0xd7   : > { %v618_v35 = vadd.f32 %v2088_v29, %v617_v34  ;;  %v808_v36 = vmax.f32 %v626_v32, 0.0 }
  0xd8   : > { %v1807_v37 = vpop.f32.mrf.mxu0 }
  0xd9   : > { %v806_v39 = vmax.f32 %v618_v35, 0.0  ;;  %v854_v43 = vpack.c.bf16 %v808_v36, %v807_v40  ;;  %v639_v47 = vadd.f32 %v1807_v37, %v2088_v29 }
  0xda   : > { %v630_v41 = vpop.f32.mrf.mxu0 }
  0xdb   : > { %v853_v42 = vpack.c.bf16 %v806_v39, %v805_v38  ;;  %v631_v45 = vadd.f32 %v2088_v29, %v630_v41  ;;  %v811_v54 = vmax.f32 %v639_v47, 0.0 }
  0xdc   : > { %v1808_v44 = vpop.f32.mrf.mxu0 }
  0xdd   : > { %v642_v46 = vadd.f32 %v1808_v44, %v2088_v29  ;;  %1853 = vmatprep.mubr.msk.bf16.mxu1 %vm900_vm1, %v853_v42  ;;  %v809_v52 = vmax.f32 %v631_v45, 0.0 }
  0xde   : > { %v633_v48 = vpop.f32.mrf.mxu0  ;;  %1854 = vmatmul.mubr.msk.bf16.vlgmr.msra.gmra.mxu1 %vm900_vm1, %v854_v43 }
  0xdf   : > { %v634_v49 = vadd.f32 %v2088_v29, %v633_v48  ;;  %v812_v50 = vmax.f32 %v642_v46, 0.0 }
  0xe0   : > { %v1811_v51 = vpop.f32.mrf.mxu0 }
  0xe1   : > { %v810_v53 = vmax.f32 %v634_v49, 0.0  ;;  %v856_v57 = vpack.c.bf16 %v812_v50, %v811_v54  ;;  %v655_v61 = vadd.f32 %v1811_v51, %v2088_v29 }
  0xe2   : > { %v646_v55 = vpop.f32.mrf.mxu0 }
  0xe3   : > { %v855_v56 = vpack.c.bf16 %v810_v53, %v809_v52  ;;  %v647_v59 = vadd.f32 %v2088_v29, %v646_v55  ;;  %v815_v4 = vmax.f32 %v655_v61, 0.0 }
  0xe4   : > { %v1812_v58 = vpop.f32.mrf.mxu0 }
  0xe5   : > { %v658_v60 = vadd.f32 %v1812_v58, %v2088_v29  ;;  %1857 = vmatprep.mubr.msk.bf16.mxu1 %vm900_vm1, %v855_v56  ;;  %v813_v2 = vmax.f32 %v647_v59, 0.0 }
  0xe6   : > { %v649_v62 = vpop.f32.mrf.mxu0  ;;  %1858 = vmatmul.mubr.msk.bf16.gmra.mxu1 %vm900_vm1, %v856_v57 }
  0xe7   : > { %v650_v63 = vadd.f32 %v2088_v29, %v649_v62  ;;  %v816_v0 = vmax.f32 %v658_v60, 0.0 }
  0xe8   : > { %v1815_v1 = vpop.f32.mrf.mxu0 }
  0xe9   : > { %v814_v3 = vmax.f32 %v650_v63, 0.0  ;;  %v858_v7 = vpack.c.bf16 %v816_v0, %v815_v4  ;;  %v671_v11 = vadd.f32 %v1815_v1, %v2088_v29 }
  0xea   : > { %v662_v5 = vpop.f32.mrf.mxu0 }
  0xeb   : > { %v857_v6 = vpack.c.bf16 %v814_v3, %v813_v2  ;;  %v663_v9 = vadd.f32 %v2088_v29, %v662_v5  ;;  %v819_v18 = vmax.f32 %v671_v11, 0.0 }
  0xec   : > { %v1816_v8 = vpop.f32.mrf.mxu0 }
  0xed   : > { %v674_v10 = vadd.f32 %v1816_v8, %v2088_v29  ;;  %1861 = vmatprep.mubr.msk.bf16.mxu1 %vm900_vm1, %v857_v6  ;;  %v817_v16 = vmax.f32 %v663_v9, 0.0 }
  0xee   : > { %v665_v12 = vpop.f32.mrf.mxu0  ;;  %1862 = vmatmul.mubr.msk.bf16.gmra.mxu1 %vm900_vm1, %v858_v7 }
  0xef   : > { %v666_v13 = vadd.f32 %v2088_v29, %v665_v12  ;;  %v820_v14 = vmax.f32 %v674_v10, 0.0 }
  0xf0   : > { %v1819_v15 = vpop.f32.mrf.mxu0 }
  0xf1   : > { %v818_v17 = vmax.f32 %v666_v13, 0.0  ;;  %v860_v21 = vpack.c.bf16 %v820_v14, %v819_v18  ;;  %v687_v25 = vadd.f32 %v1819_v15, %v2088_v29 }
  0xf2   : > { %v678_v19 = vpop.f32.mrf.mxu0 }
  0xf3   : > { %v859_v20 = vpack.c.bf16 %v818_v17, %v817_v16  ;;  %v679_v23 = vadd.f32 %v2088_v29, %v678_v19  ;;  %v823_v33 = vmax.f32 %v687_v25, 0.0 }
  0xf4   : > { %v1820_v22 = vpop.f32.mrf.mxu0 }
  0xf5   : > { %v690_v24 = vadd.f32 %v1820_v22, %v2088_v29  ;;  %1865 = vmatprep.mubr.msk.bf16.mxu1 %vm900_vm1, %v859_v20  ;;  %v821_v31 = vmax.f32 %v679_v23, 0.0 }
  0xf6   : > { %v681_v26 = vpop.f32.mrf.mxu0  ;;  %1866 = vmatmul.mubr.msk.bf16.gmra.mxu1 %vm900_vm1, %v860_v21 }
  0xf7   : > { %v682_v27 = vadd.f32 %v2088_v29, %v681_v26  ;;  %v824_v28 = vmax.f32 %v690_v24, 0.0 }
  0xf8   : > { %v1823_v30 = vpop.f32.mrf.mxu0 }
  0xf9   : > { %v822_v32 = vmax.f32 %v682_v27, 0.0  ;;  %v862_v36 = vpack.c.bf16 %v824_v28, %v823_v33  ;;  %v703_v40 = vadd.f32 %v1823_v30, %v2088_v29 }
  0xfa   : > { %v694_v34 = vpop.f32.mrf.mxu0 }
  0xfb   : > { %v861_v35 = vpack.c.bf16 %v822_v32, %v821_v31  ;;  %v695_v38 = vadd.f32 %v2088_v29, %v694_v34  ;;  %v827_v47 = vmax.f32 %v703_v40, 0.0 }
  0xfc   : > { %v1824_v37 = vpop.f32.mrf.mxu0 }
  0xfd   : > { %v706_v39 = vadd.f32 %v1824_v37, %v2088_v29  ;;  %1869 = vmatprep.mubr.msk.bf16.mxu1 %vm900_vm1, %v861_v35  ;;  %v825_v45 = vmax.f32 %v695_v38, 0.0 }
  0xfe   : > { %v697_v41 = vpop.f32.mrf.mxu0  ;;  %1870 = vmatmul.mubr.msk.bf16.gmra.mxu1 %vm900_vm1, %v862_v36 }
  0xff   : > { %v698_v42 = vadd.f32 %v2088_v29, %v697_v41  ;;  %v828_v43 = vmax.f32 %v706_v39, 0.0 }
 0x100   : > { %v1827_v44 = vpop.f32.mrf.mxu0 }
 0x101   : > { %v826_v46 = vmax.f32 %v698_v42, 0.0  ;;  %v864_v50 = vpack.c.bf16 %v828_v43, %v827_v47  ;;  %v719_v54 = vadd.f32 %v1827_v44, %v2088_v29 }
 0x102   : > { %v710_v48 = vpop.f32.mrf.mxu0 }
 0x103   : > { %v863_v49 = vpack.c.bf16 %v826_v46, %v825_v45  ;;  %v711_v52 = vadd.f32 %v2088_v29, %v710_v48  ;;  %v831_v61 = vmax.f32 %v719_v54, 0.0 }
 0x104   : > { %v1828_v51 = vpop.f32.mrf.mxu0 }
 0x105   : > { %v722_v53 = vadd.f32 %v1828_v51, %v2088_v29  ;;  %1873 = vmatprep.mubr.msk.bf16.mxu1 %vm900_vm1, %v863_v49  ;;  %v829_v59 = vmax.f32 %v711_v52, 0.0 }
 0x106   : > { %v713_v55 = vpop.f32.mrf.mxu0  ;;  %1874 = vmatmul.mubr.msk.bf16.gmra.mxu1 %vm900_vm1, %v864_v50 }
 0x107   : > { %v714_v56 = vadd.f32 %v2088_v29, %v713_v55  ;;  %v832_v57 = vmax.f32 %v722_v53, 0.0 }
 0x108   : > { %v1831_v58 = vpop.f32.mrf.mxu0 }
 0x109   : > { %v830_v60 = vmax.f32 %v714_v56, 0.0  ;;  %v866_v0 = vpack.c.bf16 %v832_v57, %v831_v61  ;;  %v735_v4 = vadd.f32 %v1831_v58, %v2088_v29  ;;  %v1966_v56 = vmov 1966171168  }
 0x10a   : > { %v726_v62 = vpop.f32.mrf.mxu0  ;;  %v1273_v57 = vunpack.c.l.s4 %v1966_v56  ;;  %v1275_v58 = vlaneseq }
 0x10b   : > { %v865_v63 = vpack.c.bf16 %v830_v60, %v829_v59  ;;  %v727_v2 = vadd.f32 %v2088_v29, %v726_v62  ;;  %v835_v11 = vmax.f32 %v735_v4, 0.0 }
 0x10c   : > { %v1832_v1 = vpop.f32.mrf.mxu0  ;;  %v1274_v62 = vunpack.c.0.s8 %v1273_v57 }
 0x10d   : > { %v738_v3 = vadd.f32 %v1832_v1, %v2088_v29  ;;  %1877 = vmatprep.mubr.msk.bf16.mxu1 %vm900_vm1, %v865_v63  ;;  %v833_v9 = vmax.f32 %v727_v2, 0.0  ;;  %v2162_v63 = vshrl.u32 %v1275_v58, 7 }
 0x10e   : > { %v729_v5 = vpop.f32.mrf.mxu0  ;;  %1878 = vmatmul.mubr.msk.bf16.gmra.mxu1 %vm900_vm1, %v866_v0  ;;  %v2165_v0 = vld.sshfl [vmem:[%s318_s23] sm:$0x11 pattern:$0x75316420] }
 0x10f   : > { %v730_v6 = vadd.f32 %v2088_v29, %v729_v5  ;;  %v836_v7 = vmax.f32 %v738_v3, 0.0  ;;  %v1271_v2 = vcombine.high %v2165_v0, %v2165_v0  ;;  %v2171_v3 = vsub.s32 %v1274_v62, %v2162_v63 }
 0x110   : > { %v1835_v8 = vpop.f32.mrf.mxu0 }
 0x111   : > { %v834_v10 = vmax.f32 %v730_v6, 0.0  ;;  %v868_v14 = vpack.c.bf16 %v836_v7, %v835_v11  ;;  %v751_v18 = vadd.f32 %v1835_v8, %v2088_v29  ;;  %v1285_v8 = vrot.slane %v1271_v2, %v2171_v3 }
 0x112   : > { %v742_v12 = vpop.f32.mrf.mxu0 }
 0x113   : > { %v867_v13 = vpack.c.bf16 %v834_v10, %v833_v9  ;;  %v743_v16 = vadd.f32 %v2088_v29, %v742_v12  ;;  %v839_v25 = vmax.f32 %v751_v18, 0.0  ;;  %1320 = vmatprep.mubr.bf16.mxu0 %v1285_v8 }
 0x114   : > { %v1836_v15 = vpop.f32.mrf.mxu0 }
 0x115   : > { %v754_v17 = vadd.f32 %v1836_v15, %v2088_v29  ;;  %1881 = vmatprep.mubr.msk.bf16.mxu1 %vm900_vm1, %v867_v13  ;;  %v837_v23 = vmax.f32 %v743_v16, 0.0  ;;  %v2183_v16 = vld [vmem:[%s2319_s5] ss:$0 sm:$0xff] }
 0x116   : > { %v745_v19 = vpop.f32.mrf.mxu0  ;;  %1882 = vmatmul.mubr.msk.bf16.gmra.mxu1 %vm900_vm1, %v868_v14 }
 0x117   : > { %v746_v20 = vadd.f32 %v2088_v29, %v745_v19  ;;  %v840_v21 = vmax.f32 %v754_v17, 0.0 }
 0x118   : > { %v1839_v22 = vpop.f32.mrf.mxu0 }
 0x119   : > { %v838_v24 = vmax.f32 %v746_v20, 0.0  ;;  %v870_v28 = vpack.c.bf16 %v840_v21, %v839_v25  ;;  %v767_v33 = vadd.f32 %v1839_v22, %v2088_v29 }
 0x11a   : > { %v758_v26 = vpop.f32.mrf.mxu0 }
 0x11b   : > { %v869_v27 = vpack.c.bf16 %v838_v24, %v837_v23  ;;  %v759_v31 = vadd.f32 %v2088_v29, %v758_v26  ;;  %v843_v39 = vmax.f32 %v767_v33, 0.0 }
 0x11c   : > { %v1840_v30 = vpop.f32.mrf.mxu0 }
 0x11d   : > { %v770_v32 = vadd.f32 %v1840_v30, %v2088_v29  ;;  %1885 = vmatprep.mubr.msk.bf16.mxu1 %vm900_vm1, %v869_v27  ;;  %v841_v37 = vmax.f32 %v759_v31, 0.0 }
 0x11e   : > { %v761_v34 = vpop.f32.mrf.mxu0  ;;  %1886 = vmatmul.mubr.msk.bf16.gmra.mxu1 %vm900_vm1, %v870_v28 }
 0x11f   : > { %v762_v35 = vadd.f32 %v2088_v29, %v761_v34  ;;  %v844_v36 = vmax.f32 %v770_v32, 0.0 }
 0x120   : > { %v1843_v42 = vpop.f32.mrf.mxu0 }
 0x121   : > { %v842_v38 = vmax.f32 %v762_v35, 0.0  ;;  %v872_v41 = vpack.c.bf16 %v844_v36, %v843_v39  ;;  %v783_v48 = vadd.f32 %v1843_v42, %v2088_v29 }
 0x122   : > { %v774_v43 = vpop.f32.mrf.mxu0 }
 0x123   : > { %v871_v40 = vpack.c.bf16 %v842_v38, %v841_v37  ;;  %v775_v46 = vadd.f32 %v2088_v29, %v774_v43  ;;  %v847_v53 = vmax.f32 %v783_v48, 0.0 }
 0x124   : > { %v1844_v44 = vpop.f32.mrf.mxu0 }
 0x125   : > { %1889 = vmatprep.mubr.msk.bf16.mxu1 %vm900_vm1, %v871_v40  ;;  %v786_v49 = vadd.f32 %v1844_v44, %v2088_v29  ;;  %v845_v51 = vmax.f32 %v775_v46, 0.0 }
 0x126   : > { %1890 = vmatmul.mubr.msk.bf16.gmra.mxu1 %vm900_vm1, %v872_v41  ;;  %v777_v45 = vpop.f32.mrf.mxu0 }
 0x127   : > { %v778_v47 = vadd.f32 %v2088_v29, %v777_v45  ;;  %v848_v54 = vmax.f32 %v786_v49, 0.0 }
 0x128   : > { %v1847_v50 = vpop.f32.mrf.mxu0 }
 0x129   : > { %v846_v52 = vmax.f32 %v778_v47, 0.0  ;;  %v874_v60 = vpack.c.bf16 %v848_v54, %v847_v53  ;;  %v799_v6 = vadd.f32 %v1847_v50, %v2088_v29 }
 0x12a   : > { %v790_v55 = vpop.f32.mrf.mxu0 }
 0x12b   : > { %v873_v59 = vpack.c.bf16 %v846_v52, %v845_v51  ;;  %v791_v4 = vadd.f32 %v2088_v29, %v790_v55  ;;  %v851_v11 = vmax.f32 %v799_v6, 0.0 }
 0x12c   : > { %v1848_v61 = vpop.f32.mrf.mxu0 }
 0x12d   : > { %1893 = vmatprep.mubr.msk.bf16.mxu1 %vm900_vm1, %v873_v59  ;;  %v802_v7 = vadd.f32 %v1848_v61, %v2088_v29  ;;  %v849_v9 = vmax.f32 %v791_v4, 0.0 }
 0x12e   : > { %1894 = vmatmul.mubr.msk.bf16.gmra.mxu1 %vm900_vm1, %v874_v60  ;;  %v793_v1 = vpop.f32.mrf.mxu0 }
 0x12f   : > { %v794_v5 = vadd.f32 %v2088_v29, %v793_v1  ;;  %v852_v12 = vmax.f32 %v802_v7, 0.0 }
 0x131   : > { %v850_v10 = vmax.f32 %v794_v5, 0.0  ;;  %v876_v14 = vpack.c.bf16 %v852_v12, %v851_v11 }
 0x133   : > { %v875_v13 = vpack.c.bf16 %v850_v10, %v849_v9 }
 0x135   : > { %1897 = vmatprep.mubr.msk.bf16.mxu1 %vm900_vm1, %v875_v13 }
 0x136   : > { %1898 = vmatmul.mubr.msk.bf16.gmra.mxu1 %vm900_vm1, %v876_v14 }
 0x19e   : > { %v1855_v15 = vpop.f32.mrf.mxu1 }
 0x19f   : > { %v1016_v17 = vadd.f32 %v1855_v15, %v2183_v16 }
 0x1a0   : > { %v1007_v29 = vpop.f32.mrf.mxu1 }
 0x1a1   : > { %v1008_v19 = vadd.f32 %v2183_v16, %v1007_v29  ;;  %v1200_v22 = vmax.f32 %v1016_v17, 0.0 }
 0x1a2   : > { %v1856_v18 = vpop.f32.mrf.mxu1 }
 0x1a3   : > { %v1019_v20 = vadd.f32 %v1856_v18, %v2183_v16  ;;  %v1198_v26 = vmax.f32 %v1008_v19, 0.0 }
 0x1a4   : > { %v1010_v21 = vpop.f32.mrf.mxu1 }
 0x1a5   : > { %v1201_v23 = vmax.f32 %v1019_v20, 0.0  ;;  %v1011_v24 = vadd.f32 %v2183_v16, %v1010_v21 }
 0x1a6   : > { %v1859_v25 = vpop.f32.mrf.mxu1 }
 0x1a7   : > { %v2189_v27 = vpack.c.bf16 %v1201_v23, %v1200_v22  ;;  %v1199_v28 = vmax.f32 %v1011_v24, 0.0  ;;  %v1032_v32 = vadd.f32 %v1859_v25, %v2183_v16 }
 0x1a8   : > { %v1023_v30 = vpop.f32.mrf.mxu1 }
 0x1a9   : > { %v2191_v31 = vpack.c.bf16 %v1199_v28, %v1198_v26  ;;  %v1024_v34 = vadd.f32 %v2183_v16, %v1023_v30  ;;  %v1204_v37 = vmax.f32 %v1032_v32, 0.0 }
 0x1aa   : > { %v1860_v33 = vpop.f32.mrf.mxu1 }
 0x1ab   : > { %v1035_v35 = vadd.f32 %v1860_v33, %v2183_v16  ;;  %v1202_v41 = vmax.f32 %v1024_v34, 0.0 }
 0x1ac   : > { %v1026_v36 = vpop.f32.mrf.mxu1 }
 0x1ad   : > { %v1205_v38 = vmax.f32 %v1035_v35, 0.0  ;;  %v1027_v39 = vadd.f32 %v2183_v16, %v1026_v36 }
 0x1ae   : > { %v1863_v40 = vpop.f32.mrf.mxu1 }
 0x1af   : > { %v2197_v42 = vpack.c.bf16 %v1205_v38, %v1204_v37  ;;  %v1203_v43 = vmax.f32 %v1027_v39, 0.0  ;;  %v1048_v46 = vadd.f32 %v1863_v40, %v2183_v16 }
 0x1b0   : > { %v1039_v44 = vpop.f32.mrf.mxu1 }
 0x1b1   : > { %v2199_v45 = vpack.c.bf16 %v1203_v43, %v1202_v41  ;;  %v1040_v48 = vadd.f32 %v2183_v16, %v1039_v44  ;;  %v1208_v51 = vmax.f32 %v1048_v46, 0.0 }
 0x1b2   : > { %v1864_v47 = vpop.f32.mrf.mxu1 }
 0x1b3   : > { %v1051_v49 = vadd.f32 %v1864_v47, %v2183_v16  ;;  %v1206_v55 = vmax.f32 %v1040_v48, 0.0 }
 0x1b4   : > { %v1042_v50 = vpop.f32.mrf.mxu1 }
 0x1b5   : > { %v1209_v52 = vmax.f32 %v1051_v49, 0.0  ;;  %v1043_v53 = vadd.f32 %v2183_v16, %v1042_v50 }
 0x1b6   : > { %v1867_v54 = vpop.f32.mrf.mxu1 }
 0x1b7   : > { %v2205_v56 = vpack.c.bf16 %v1209_v52, %v1208_v51  ;;  %v1207_v57 = vmax.f32 %v1043_v53, 0.0  ;;  %v1064_v25 = vadd.f32 %v1867_v54, %v2183_v16 }
 0x1b8   : > { %v1055_v58 = vpop.f32.mrf.mxu1 }
 0x1b9   : > { %v2207_v59 = vpack.c.bf16 %v1207_v57, %v1206_v55  ;;  %v1212_v39 = vmax.f32 %v1064_v25, 0.0  ;;  %v1056_v40 = vadd.f32 %v2183_v16, %v1055_v58 }
 0x1ba   : > { %v1868_v60 = vpop.f32.mrf.mxu1 }
 0x1bb   : > { %v1067_v22 = vadd.f32 %v1868_v60, %v2183_v16  ;;  %v1210_v52 = vmax.f32 %v1056_v40, 0.0 }
 0x1bc   : > { %v1058_v61 = vpop.f32.mrf.mxu1 }
 0x1bd   : > { %v1213_v32 = vmax.f32 %v1067_v22, 0.0  ;;  %v1059_v33 = vadd.f32 %v2183_v16, %v1058_v61 }
 0x1be   : > { %v2209_v62 = vpop.f32.mrf.mxu1 }
 0x1bf   : > { %v1254_v47 = vpack.c.bf16 %v1213_v32, %v1212_v39  ;;  %v1211_v48 = vmax.f32 %v1059_v33, 0.0 }
 0x1c0   : > { %v2211_v1 = vpop.f32.mrf.mxu1 }
 0x1c1   : > { %v1253_v55 = vpack.c.bf16 %v1211_v48, %v1210_v52 }
 0x1c2   : > { %v2213_v2 = vpop.f32.mrf.mxu1 }
 0x1c4   : > { %v2215_v4 = vpop.f32.mrf.mxu1 }
 0x1c6   : > { %v2217_v5 = vpop.f32.mrf.mxu1 }
 0x1c8   : > { %v2219_v6 = vpop.f32.mrf.mxu1 }
 0x1ca   : > { %v2221_v7 = vpop.f32.mrf.mxu1 }
 0x1cc   : > { %v2223_v8 = vpop.f32.mrf.mxu1 }
 0x1ce   : > { %v2225_v9 = vpop.f32.mrf.mxu1 }
 0x1d0   : > { %v2227_v10 = vpop.f32.mrf.mxu1 }
 0x1d2   : > { %v1880_v11 = vpop.f32.mrf.mxu1 }
 0x1d4   : > { %v2229_v12 = vpop.f32.mrf.mxu1 }
 0x1d6   : > { %v1883_v13 = vpop.f32.mrf.mxu1 }
 0x1d7   : > { %v1128_v61 = vadd.f32 %v1883_v13, %v2183_v16  ;;  %v1112_v13 = vadd.f32 %v2225_v9, %v2183_v16 }
 0x1d8   : > { %v1119_v14 = vpop.f32.mrf.mxu1 }
 0x1d9   : > { %v1228_v22 = vmax.f32 %v1128_v61, 0.0 }
 0x1da   : > { %v1884_v15 = vpop.f32.mrf.mxu1 }
 0x1db   : > { %v1131_v57 = vadd.f32 %v1884_v15, %v2183_v16 }
 0x1dc   : > { %v1122_v29 = vpop.f32.mrf.mxu1 }
 0x1de   : > { %v1887_v17 = vpop.f32.mrf.mxu1 }
 0x1df   : > { %v1144_v41 = vadd.f32 %v1887_v17, %v2183_v16 }
 0x1e0   : > { %v1135_v18 = vpop.f32.mrf.mxu1 }
 0x1e1   : > { %v1232_v53 = vmax.f32 %v1144_v41, 0.0  ;;  %v1136_v54 = vadd.f32 %v2183_v16, %v1135_v18  ;;  %v1120_v18 = vadd.f32 %v2183_v16, %v1119_v14  ;;  %v1224_v14 = vmax.f32 %v1112_v13, 0.0 }
 0x1e2   : > { %v1888_v19 = vpop.f32.mrf.mxu1  ;;  %v1096_v41 = vadd.f32 %v2217_v5, %v2183_v16 }
 0x1e3   : > { %v1147_v35 = vadd.f32 %v1888_v19, %v2183_v16  ;;  %v1230_v17 = vmax.f32 %v1136_v54, 0.0  ;;  %v1229_v19 = vmax.f32 %v1131_v57, 0.0  ;;  %v1226_v25 = vmax.f32 %v1120_v18, 0.0 }
 0x1e4   : > { %v1138_v20 = vpop.f32.mrf.mxu1 }
 0x1e5   : > { %v1233_v49 = vmax.f32 %v1147_v35, 0.0  ;;  %v1139_v50 = vadd.f32 %v2183_v16, %v1138_v20  ;;  %v1123_v20 = vadd.f32 %v2183_v16, %v1122_v29  ;;  %v1258_v15 = vpack.c.bf16 %v1229_v19, %v1228_v22 }
 0x1e6   : > { %v1891_v21 = vpop.f32.mrf.mxu1  ;;  %v1107_v29 = vadd.f32 %v2183_v16, %v2229_v12  ;;  %v1278_v12 = vrot.slane %v2165_v0, %v2171_v3  ;;  %v1080_v0 = vadd.f32 %v2209_v62, %v2183_v16  ;;  %v1099_v62 = vadd.f32 %v2221_v7, %v2183_v16 }
 0x1e7   : > { %v1160_v24 = vadd.f32 %v1891_v21, %v2183_v16  ;;  %v1260_v58 = vpack.c.bf16 %v1233_v49, %v1232_v53  ;;  %v1231_v60 = vmax.f32 %v1139_v50, 0.0  ;;  %v1220_v53 = vmax.f32 %v1096_v41, 0.0 }
 0x1e8   : > { %v1151_v23 = vpop.f32.mrf.mxu1  ;;  %v1221_v54 = vmax.f32 %v1099_v62, 0.0 }
 0x1e9   : > { %v1152_v28 = vadd.f32 %v2183_v16, %v1151_v23  ;;  %v1236_v36 = vmax.f32 %v1160_v24, 0.0  ;;  %v1259_v21 = vpack.c.bf16 %v1231_v60, %v1230_v17  ;;  %v1115_v23 = vadd.f32 %v1880_v11, %v2183_v16 }
 0x1ea   : > { %v1892_v26 = vpop.f32.mrf.mxu1  ;;  %v1227_v24 = vmax.f32 %v1123_v20, 0.0  ;;  %v1104_v11 = vadd.f32 %v2183_v16, %v2227_v10 }
 0x1eb   : > { %v1163_v30 = vadd.f32 %v1892_v26, %v2183_v16  ;;  %v1234_v43 = vmax.f32 %v1152_v28, 0.0  ;;  %v1225_v26 = vmax.f32 %v1115_v23, 0.0 }
 0x1ec   : > { %v1154_v34 = vpop.f32.mrf.mxu1 }
 0x1ed   : > { %v1237_v37 = vmax.f32 %v1163_v30, 0.0  ;;  %v1155_v38 = vadd.f32 %v2183_v16, %v1154_v34  ;;  %v1256_v28 = vpack.c.bf16 %v1225_v26, %v1224_v14  ;;  %v1223_v30 = vmax.f32 %v1107_v29, 0.0 }
 0x1ef   : > { %v1262_v44 = vpack.c.bf16 %v1237_v37, %v1236_v36  ;;  %v1235_v46 = vmax.f32 %v1155_v38, 0.0  ;;  %v1083_v37 = vadd.f32 %v2213_v2, %v2183_v16  ;;  %v1075_v38 = vadd.f32 %v2183_v16, %v2215_v4 }
 0x1f1   : > { %v1261_v51 = vpack.c.bf16 %v1235_v46, %v1234_v43  ;;  %1768 = vmatprep.subr.bf16.mxu0 %v1262_v44  ;;  %v1088_v43 = vadd.f32 %v2183_v16, %v2219_v6  ;;  %v1353_v46 = vsub.s32 0, %v2162_v63  ;;  %v1217_v50 = vmax.f32 %v1083_v37, 0.0 }
 0x1f2   : > { %1769 = vmatpush3.bf16.msra.mxu0 %v1254_v47  ;;  %v1216_v47 = vmax.f32 %v1080_v0, 0.0  ;;  %v1215_v6 = vmax.f32 %v1075_v38, 0.0 }
 0x1f3   : > { %1770 = vmatprep.subr.bf16.mxu0 %v1261_v51 }
 0x1f6   : > { %1771 = vmatpush3.bf16.msra.mxu0 %v1253_v55 }
 0x1f7   : > { %1772 = vmatprep.subr.bf16.mxu0 %v1260_v58 }
 0x1fa   : > { %1773 = vmatpush3.bf16.msra.mxu0 %v2205_v56  ;;  %v1257_v56 = vpack.c.bf16 %v1227_v24, %v1226_v25 }
 0x1fb   : > { %1774 = vmatprep.subr.bf16.mxu0 %v1259_v21 }
 0x1fe   : > { %1775 = vmatpush3.bf16.msra.mxu0 %v2207_v59  ;;  %v1222_v59 = vmax.f32 %v1104_v11, 0.0 }
 0x1ff   : > { %1776 = vmatprep.subr.bf16.mxu0 %v1258_v15 }
 0x200   : > { %v1255_v9 = vpack.c.bf16 %v1223_v30, %v1222_v59 }
 0x202   : > { %1777 = vmatpush3.bf16.msra.mxu0 %v2197_v42  ;;  %v1957_v42 = vld [vmem:[%s2320_s6] sm:$0xff]  }
 0x203   : > { %1778 = vmatprep.subr.bf16.mxu0 %v1257_v56  ;;  %1919 = vmatprep.subr.bf16.mxu1 %v1957_v42 }
 0x204   : > { %1920 = vmatpush3.bf16.msra.mxu1 %v1957_v42 }
 0x206   : > { %1779 = vmatpush3.bf16.msra.mxu0 %v2199_v45  ;;  %v1895_v45 = vpop.f32.mrf.mxu1 }
 0x207   : > { %1780 = vmatprep.subr.bf16.mxu0 %v1256_v28  ;;  %v1176_v58 = vadd.f32 %v1895_v45, %v2183_v16 }
 0x208   : > { %v1167_v10 = vpop.f32.mrf.mxu1 }
 0x209   : > { %v1168_v4 = vadd.f32 %v2183_v16, %v1167_v10  ;;  %v1240_v30 = vmax.f32 %v1176_v58, 0.0 }
 0x20a   : > { %1781 = vmatpush3.bf16.msra.mxu0 %v2189_v27  ;;  %v1896_v32 = vpop.f32.mrf.mxu1 }
 0x20b   : > { %1782 = vmatprep.subr.bf16.mxu0 %v1255_v9  ;;  %v1238_v60 = vmax.f32 %v1168_v4, 0.0  ;;  %v1179_v61 = vadd.f32 %v1896_v32, %v2183_v16 }
 0x20c   : > { %v1170_v33 = vpop.f32.mrf.mxu1 }
 0x20d   : > { %v1171_v5 = vadd.f32 %v2183_v16, %v1170_v33  ;;  %v1241_v59 = vmax.f32 %v1179_v61, 0.0 }
 0x20e   : > { %1783 = vmatpush3.bf16.msra.mxu0 %v2191_v31  ;;  %v2265_v27 = vpop.f32.mrf.mxu1  ;;  %v1072_v31 = vadd.f32 %v2183_v16, %v2211_v1  ;;  %v1091_v1 = vadd.f32 %v2183_v16, %v2223_v8  ;;  %v1218_v8 = vmax.f32 %v1088_v43, 0.0 }
 0x20f   : > { %1901 = vmatprep.subr.bf16.mxu0 %v1957_v42  ;;  %v1239_v17 = vmax.f32 %v1171_v5, 0.0  ;;  %v1192_v32 = vadd.f32 %v2265_v27, %v2183_v16 }
 0x210   : > { %v1183_v34 = vpop.f32.mrf.mxu1  ;;  %v1214_v48 = vmax.f32 %v1072_v31, 0.0  ;;  %v1219_v55 = vmax.f32 %v1091_v1, 0.0 }
 0x211   : > { %1321 = vmatmul.mubr.bf16.vlgmr.msra.gmra.mxu0 %v1278_v12  ;;  %v1184_v19 = vadd.f32 %v2183_v16, %v1183_v34  ;;  %v1244_v31 = vmax.f32 %v1192_v32, 0.0 }
 0x212   : > { %1902 = vmatpush3.bf16.msra.mxu0 %v1957_v42  ;;  %v1900_v40 = vpop.f32.mrf.mxu1 }
 0x213   : > { %v1242_v12 = vmax.f32 %v1184_v19, 0.0  ;;  %v1195_v33 = vadd.f32 %v1900_v40, %v2183_v16 }
 0x214   : > { %v1186_v52 = vpop.f32.mrf.mxu1 }
 0x215   : > { %v1187_v20 = vadd.f32 %v2183_v16, %v1186_v52  ;;  %v1705_v16 = vld [vmem:[%s2321_s7] ss:$0 sm:$0xff] }
 0x217   : > { %v1243_v42 = vmax.f32 %v1187_v20, 0.0 }
 0x2d1   : > { %v1784_v35 = vpop.f32.mrf.mxu0 }
 0x2d3   : > { %v1785_v36 = vpop.f32.mrf.mxu0 }
 0x2d4   : > { %v1786_v39 = vadd.f32 %v1785_v36, %v1784_v35  ;;  %v1245_v36 = vmax.f32 %v1195_v33, 0.0 }
 0x2d5   : > { %v1787_v44 = vpop.f32.mrf.mxu0 }
 0x2d6   : > { %v1335_v2 = vrot.slane %v1786_v39, %v2171_v3 }
 0x2d7   : > { %v1788_v49 = vpop.f32.mrf.mxu0 }
 0x2d8   : > { %v1336_v51 = vcombine.high %v1335_v2, %v1335_v2  ;;  %v1343_v7 = vrot.slane %v1335_v2, %v2171_v3 }
 0x2da   : > { %v1350_v57 = vrot.slane %v1336_v51, %v2171_v3  ;;  %v1354_v63 = vrot.slane %v1343_v7, %v1353_v46 }
 0x2dc   : > { %v1358_v21 = vrot.slane %v1350_v57, %v1353_v46  ;;  %v1361_v22 = vmul.f32 %v1354_v63, %v1214_v48  ;;  %v1362_v18 = vmul.f32 %v1354_v63, %v1215_v6  ;;  %v1365_v23 = vmul.f32 %v1354_v63, %v1218_v8 }
 0x2dd   : > { %v1366_v15 = vmul.f32 %v1354_v63, %v1219_v55  ;;  %v1363_v24 = vmul.f32 %v1354_v63, %v1216_v47  ;;  %v1364_v13 = vmul.f32 %v1354_v63, %v1217_v50  ;;  %v1367_v25 = vmul.f32 %v1354_v63, %v1220_v53 }
 0x2de   : > { %v1377_v3 = vpack.c.bf16 %v1362_v18, %v1361_v22  ;;  %v1368_v26 = vmul.f32 %v1354_v63, %v1221_v54  ;;  %v1369_v29 = vmul.f32 %v1358_v21, %v1238_v60  ;;  %v1370_v11 = vmul.f32 %v1358_v21, %v1239_v17 }
 0x2df   : > { %v1379_v56 = vpack.c.bf16 %v1366_v15, %v1365_v23  ;;  %v1378_v14 = vpack.c.bf16 %v1364_v13, %v1363_v24  ;;  %v1371_v45 = vmul.f32 %v1358_v21, %v1240_v30  ;;  %v1372_v10 = vmul.f32 %v1358_v21, %v1241_v59 }
 0x2e0   : > { %1903 = vmatprep.mubr.msk.bf16.mxu0 %vm507_vm0, %v1377_v3  ;;  %v1380_v28 = vpack.c.bf16 %v1368_v26, %v1367_v25  ;;  %v1381_v9 = vpack.c.bf16 %v1370_v11, %v1369_v29  ;;  %v1373_v34 = vmul.f32 %v1358_v21, %v1242_v12  ;;  %v1374_v35 = vmul.f32 %v1358_v21, %v1243_v42 }
 0x2e1   : > { %1907 = vmatprep.mubr.msk.bf16.mxu1 %vm507_vm0, %v1379_v56  ;;  %1904 = vmatmul.mubr.msk.bf16.vlgmr.msra.gmra.mxu0 %vm507_vm0, %v1378_v14  ;;  %v1382_v0 = vpack.c.bf16 %v1372_v10, %v1371_v45  ;;  %v1375_v38 = vmul.f32 %v1358_v21, %v1244_v31  ;;  %v1376_v39 = vmul.f32 %v1358_v21, %v1245_v36 }
 0x2e2   : > { %1908 = vmatmul.mubr.msk.bf16.vlgmr.msra.gmra.mxu1 %vm507_vm0, %v1380_v28  ;;  %v1383_v37 = vpack.c.bf16 %v1374_v35, %v1373_v34 }
 0x2e3   : > { %1911 = vmatprep.mubr.msk.bf16.mxu1 %vm507_vm0, %v1381_v9  ;;  %v1384_v41 = vpack.c.bf16 %v1376_v39, %v1375_v38 }
 0x2ea   : > { %1912 = vmatmul.mubr.msk.bf16.gmra.mxu1 %vm507_vm0, %v1382_v0 }
 0x2eb   : > { %1915 = vmatprep.mubr.msk.bf16.mxu1 %vm507_vm0, %v1383_v37 }
 0x2f2   : > { %1916 = vmatmul.mubr.msk.bf16.gmra.mxu1 %vm507_vm0, %v1384_v41 }
 0x3a1   : > { %v1905_v43 = vpop.f32.mrf.mxu0 }
 0x3a2   : > { %v1909_v2 = vpop.f32.mrf.mxu1  ;;  %v1467_v46 = vadd.f32 %v1905_v43, %v1705_v16 }
 0x3a3   : > { %v1458_v27 = vpop.f32.mrf.mxu0  ;;  %v1483_v51 = vadd.f32 %v1909_v2, %v1705_v16 }
 0x3a4   : > { %v1459_v40 = vadd.f32 %v1705_v16, %v1458_v27  ;;  %v1474_v4 = vpop.f32.mrf.mxu1 }
 0x3a5   : > { %v1906_v62 = vpop.f32.mrf.mxu0  ;;  %v1475_v5 = vadd.f32 %v1705_v16, %v1474_v4 }
 0x3a6   : > { %1521 = vxpose.xlu0.b32.start [1/16] (narrow) %v1459_v40, 8  ;;  %v1470_v47 = vadd.f32 %v1906_v62, %v1705_v16  ;;  %v1910_v48 = vpop.f32.mrf.mxu1 }
 0x3a7   : > { %v1461_v1 = vpop.f32.mrf.mxu0  ;;  %v1486_v52 = vadd.f32 %v1910_v48, %v1705_v16 }
 0x3a8   : > { %v1462_v44 = vadd.f32 %v1705_v16, %v1461_v1  ;;  %v1477_v49 = vpop.f32.mrf.mxu1 }
 0x3a9   : > { %v1478_v50 = vadd.f32 %v1705_v16, %v1477_v49 }
 0x3aa   : > { %1522 = vxpose.xlu0.b32.cont [2/16] (narrow) %v1462_v44, 8  ;;  %v1913_v6 = vpop.f32.mrf.mxu1 }
 0x3ab   : > { %v1499_v63 = vadd.f32 %v1913_v6, %v1705_v16 }
 0x3ac   : > { %v1490_v7 = vpop.f32.mrf.mxu1 }
 0x3ad   : > { %v1491_v8 = vadd.f32 %v1705_v16, %v1490_v7 }
 0x3ae   : > { %1523 = vxpose.xlu0.b32.cont [3/16] (narrow) %v1467_v46, 8  ;;  %v1914_v53 = vpop.f32.mrf.mxu1 }
 0x3af   : > { %v1502_v60 = vadd.f32 %v1914_v53, %v1705_v16 }
 0x3b0   : > { %v1493_v54 = vpop.f32.mrf.mxu1 }
 0x3b1   : > { %v1494_v55 = vadd.f32 %v1705_v16, %v1493_v54 }
 0x3b2   : > { %1524 = vxpose.xlu0.b32.cont [4/16] (narrow) %v1470_v47, 8  ;;  %v1917_v57 = vpop.f32.mrf.mxu1 }
 0x3b3   : > { %v1515_v21 = vadd.f32 %v1917_v57, %v1705_v16 }
 0x3b4   : > { %v1506_v58 = vpop.f32.mrf.mxu1 }
 0x3b5   : > { %v1507_v17 = vadd.f32 %v1705_v16, %v1506_v58 }
 0x3b6   : > { %1525 = vxpose.xlu0.b32.cont [5/16] (narrow) %v1475_v5, 8  ;;  %v1918_v61 = vpop.f32.mrf.mxu1 }
 0x3b7   : > { %v1518_v22 = vadd.f32 %v1918_v61, %v1705_v16 }
 0x3b8   : > { %v1509_v19 = vpop.f32.mrf.mxu1 }
 0x3b9   : > { %v1510_v20 = vadd.f32 %v1705_v16, %v1509_v19 }
 0x3ba   : > { %1526 = vxpose.xlu0.b32.cont [6/16] (narrow) %v1478_v50, 8 }
 0x3be   : > { %1527 = vxpose.xlu0.b32.cont [7/16] (narrow) %v1483_v51, 8 }
 0x3c2   : > { %1528 = vxpose.xlu0.b32.cont [8/16] (narrow) %v1486_v52, 8 }
 0x3c6   : > { %1529 = vxpose.xlu0.b32.cont [9/16] (narrow) %v1491_v8, 8 }
 0x3ca   : > { %1530 = vxpose.xlu0.b32.cont [10/16] (narrow) %v1494_v55, 8 }
 0x3ce   : > { %1531 = vxpose.xlu0.b32.cont [11/16] (narrow) %v1499_v63, 8 }
 0x3d2   : > { %1532 = vxpose.xlu0.b32.cont [12/16] (narrow) %v1502_v60, 8 }
 0x3d6   : > { %1533 = vxpose.xlu0.b32.cont [13/16] (narrow) %v1507_v17, 8 }
 0x3da   : > { %1534 = vxpose.xlu0.b32.cont [14/16] (narrow) %v1510_v20, 8 }
 0x3de   : > { %1535 = vxpose.xlu0.b32.cont [15/16] (narrow) %v1515_v21, 8 }
 0x3e2   : > { %1536 = vxpose.xlu0.b32.end [16/16] (narrow) %v1518_v22, 8 }
 0x422   : > { %v1537_v18 = vpop.trf.xlu0 }
 0x423   : > { %1553 = vst [vmem:[%s322_s13] sm:$0xff] %v1537_v18 }
 0x424 PF: > { %s18_s27 = sadd.s32 1, %s1964_s27  }
 0x425   : > { %p15_p5 = scmp.ge.s32.totalorder %s18_s27, 6  }
 0x427   :  { %17 = sbr.rel (!%p15_p5) target bundleno = 1 (0x1), region = 85 }

</bundles_post_ra>
